<compile_context>
chip_gen: v7x
topology: tpu7x:2x2x1
jax: 0.10.0
libtpu: 0.0.40
codegen_flags: <defaults>
</compile_context>

<pallas_src>
import jax
import jax.numpy as jnp
from jax.experimental import pallas as pl
from jax.experimental.pallas import tpu as pltpu
import numpy as np


def _round_up(x, m):
    return ((x + m - 1) // m) * m


def _bilstm_fc_step_kernel(emb_ref, wihf_ref, bf_ref, whh_ref,
                           wihb_ref, bb_ref, fcwf_ref, fcwb_ref, fcb_ref,
                           out_ref, h_scr, c_scr):
    """Grid = (batch_blocks, T).  Refs (per grid step):
       emb_ref:  (Bb, Ep)    bf16  embedded tokens for this (batch block, t)
       wihf_ref: (Ep, 4*Hp)  bf16  forward  input->gate weights (gate-padded)
       bf_ref:   (1, 4*Hp)   f32   forward  bias (b_ih + b_hh folded)
       whh_ref:  (Hp, 4*Hp)  bf16  forward  hidden->gate weights
       wihb_ref: (Ep, 4*Hp)  bf16  backward input->gate weights
       bb_ref:   (1, 4*Hp)   f32   backward bias
       fcwf_ref: (Hp, Cp)    bf16  fc rows multiplying the forward hidden
       fcwb_ref: (Hp, Cp)    bf16  fc rows multiplying the backward hidden
       fcb_ref:  (1, Cp)     f32
       out_ref:  (Bb, Cp)    f32   (written only at t == T-1)
       h_scr/c_scr: (Bb, Hp) f32   persistent LSTM state (accumulator scratch)
    """
    t = pl.program_id(1)
    T = pl.num_programs(1)
    Hp = h_scr.shape[1]

    @pl.when(t == 0)
    def _():
        h_scr[...] = jnp.zeros_like(h_scr)
        c_scr[...] = jnp.zeros_like(c_scr)

    x = emb_ref[...]                        # (Bb, Ep) bf16
    h_old = h_scr[...]                      # (Bb, Hp) f32
    c_old = c_scr[...]

    # ---- forward-direction step: input proj + recurrent term + bias ----
    gates = (jnp.dot(x, wihf_ref[...], preferred_element_type=jnp.float32)
             + jnp.dot(h_old.astype(whh_ref.dtype), whh_ref[...],
                       preferred_element_type=jnp.float32)
             + bf_ref[...])                 # (Bb, 4*Hp) f32, PyTorch order i,f,g,o

    # Consume gate slabs incrementally (keeps vreg live range low on the
    # serial recurrence critical path); every slice is 128-lane aligned.
    c_new = (jax.nn.sigmoid(gates[:, 1 * Hp:2 * Hp]) * c_old
             + jax.nn.sigmoid(gates[:, 0 * Hp:1 * Hp])
             * jnp.tanh(gates[:, 2 * Hp:3 * Hp]))
    h_new = jax.nn.sigmoid(gates[:, 3 * Hp:4 * Hp]) * jnp.tanh(c_new)
    c_scr[...] = c_new
    h_scr[...] = h_new

    @pl.when(t == T - 1)
    def _():
        # Backward-direction output at t = T-1: PyTorch's reverse scan starts
        # at the last token, so this is ONE LSTM step from a zero state.  The
        # h @ W_hh_bwd term and the forget-gate*c0 term vanish, so the gates
        # are exactly this single input projection (computed only here).
        gb = (jnp.dot(x, wihb_ref[...], preferred_element_type=jnp.float32)
              + bb_ref[...])
        c_b = (jax.nn.sigmoid(gb[:, 0 * Hp:1 * Hp])
               * jnp.tanh(gb[:, 2 * Hp:3 * Hp]))
        h_bwd = jax.nn.sigmoid(gb[:, 3 * Hp:4 * Hp]) * jnp.tanh(c_b)

        # ---- split FC (no cross-lane concat); dropout = identity at eval ----
        logits = (jnp.dot(h_new.astype(fcwf_ref.dtype), fcwf_ref[...],
                          preferred_element_type=jnp.float32)
                  + jnp.dot(h_bwd.astype(fcwb_ref.dtype), fcwb_ref[...],
                            preferred_element_type=jnp.float32)
                  + fcb_ref[...])
        out_ref[...] = logits.astype(out_ref.dtype)


def _pack_gate_weights(w, in_dim, in_pad, H, Hp, dtype):
    """(in_dim, 4H) PyTorch gate order -> (in_pad, 4*Hp), each gate lane-padded."""
    w4 = w.reshape(in_dim, 4, H)
    w4 = jnp.pad(w4, ((0, in_pad - in_dim), (0, 0), (0, Hp - H)))
    return w4.reshape(in_pad, 4 * Hp).astype(dtype)


def _pack_gate_bias(b, H, Hp):
    b4 = b.reshape(1, 4, H)
    b4 = jnp.pad(b4, ((0, 0), (0, 0), (0, Hp - H)))
    return b4.reshape(1, 4 * Hp)            # stays f32


def text_classifier_forward(tokens, params, *, batch_block=None):
    """tokens: (B, T) int32 token ids."""
    B, T = tokens.shape
    E = params["wih_f"].shape[0]
    H = params["whh_f"].shape[0]
    C = params["fc_b"].shape[-1]

    Hp = _round_up(H, 128)                   # lane-aligned gate slabs
    Ep = _round_up(E, 128)                   # lane-dense emb / MXU K fill
    Cp = _round_up(C, 128)                   # lane-dense output store

    # Batch blocking: 2 blocks when cleanly divisible so the "parallel" batch
    # grid axis shards across v7x's 2 TensorCores; toy shapes use 1 block.
    if batch_block is None:
        batch_block = B // 2 if (B >= 16 and B % 16 == 0) else B
    assert B % batch_block == 0
    Bb = batch_block
    n_blk = B // Bb

    # Embedding gather directly in bf16 (no f32 HBM round trip), time-major,
    # E lane-padded.  XLA fuses gather + transpose + pad into one bf16 output.
    emb = jnp.take(params["embedding"].astype(jnp.bfloat16), tokens, axis=0)
    emb = jnp.transpose(emb, (1, 0, 2))                      # (T, B, E)
    emb = jnp.pad(emb, ((0, 0), (0, 0), (0, Ep - E)))        # (T, B, Ep) bf16

    # Gate-padded weights (PyTorch gate order i,f,g,o), bf16 for the MXU.
    wih_f = _pack_gate_weights(params["wih_f"], E, Ep, H, Hp, jnp.bfloat16)
    wih_b = _pack_gate_weights(params["wih_b"], E, Ep, H, Hp, jnp.bfloat16)
    whh_f = _pack_gate_weights(params["whh_f"], H, Hp, H, Hp, jnp.bfloat16)
    b_f = _pack_gate_bias(params["b_f"], H, Hp)
    b_b = _pack_gate_bias(params["b_b"], H, Hp)

    # Pre-split + pad the FC layer (forward rows / backward rows).
    fcw_f = jnp.pad(params["fc_w"][:H],
                    ((0, Hp - H), (0, Cp - C))).astype(jnp.bfloat16)
    fcw_b = jnp.pad(params["fc_w"][H:],
                    ((0, Hp - H), (0, Cp - C))).astype(jnp.bfloat16)
    fcb = jnp.pad(params["fc_b"], ((0, 0), (0, Cp - C)))      # (1, Cp) f32

    def full(shape):
        nd = len(shape)
        return pl.BlockSpec(shape, lambda bi, t, _n=nd: (0,) * _n)

    out_p = pl.pallas_call(
        _bilstm_fc_step_kernel,
        out_shape=jax.ShapeDtypeStruct((B, Cp), jnp.float32),
        grid=(n_blk, T),
        in_specs=[
            # one (Bb, Ep) embedding slab per (batch block, timestep);
            # Pallas double-buffers so step t+1's DMA overlaps step t compute
            pl.BlockSpec((None, Bb, Ep), lambda bi, t: (t, bi, 0)),
            full(wih_f.shape), full(b_f.shape), full(whh_f.shape),
            full(wih_b.shape), full(b_b.shape),
            full(fcw_f.shape), full(fcw_b.shape), full(fcb.shape),
        ],
        out_specs=pl.BlockSpec((Bb, Cp), lambda bi, t: (bi, 0)),
        scratch_shapes=[pltpu.VMEM((Bb, Hp), jnp.float32),   # h
                        pltpu.VMEM((Bb, Hp), jnp.float32)],  # c
        compiler_params=pltpu.CompilerParams(
            dimension_semantics=("parallel", "arbitrary")),
    )(emb, wih_f, b_f, whh_f, wih_b, b_b, fcw_f, fcw_b, fcb)

    return out_p[:, :C]


def _reference_forward(tokens, params):
    """Pure-JAX f32 reference of the same math for a correctness check."""
    emb = jnp.take(params["embedding"], tokens, axis=0)       # (B, T, E)
    B, T, E = emb.shape
    H = params["whh_f"].shape[0]

    def cell(x_t, h, c, wih, whh, b):
        g = x_t @ wih + h @ whh + b
        i = jax.nn.sigmoid(g[:, 0 * H:1 * H])
        f = jax.nn.sigmoid(g[:, 1 * H:2 * H])
        gg = jnp.tanh(g[:, 2 * H:3 * H])
        o = jax.nn.sigmoid(g[:, 3 * H:4 * H])
        c = f * c + i * gg
        h = o * jnp.tanh(c)
        return h, c

    h = jnp.zeros((B, H), jnp.float32)
    c = jnp.zeros((B, H), jnp.float32)
    for t in range(T):
        h, c = cell(emb[:, t, :], h, c,
                    params["wih_f"], params["whh_f"], params["b_f"])
    z = jnp.zeros((B, H), jnp.float32)
    h_b, _ = cell(emb[:, T - 1, :], z, z,
                  params["wih_b"], params["whh_b"], params["b_b"])
    last = jnp.concatenate([h, h_b], axis=-1)
    return last @ params["fc_w"] + params["fc_b"]


def make_params(key, vocab, E, H, C):
    ks = jax.random.split(key, 10)
    s = 0.1
    return {
        "embedding": jax.random.normal(ks[0], (vocab, E), jnp.float32) * s,
        # forward-direction LSTM weights, stored as (in, 4H), PyTorch gate order
        "wih_f": jax.random.normal(ks[1], (E, 4 * H), jnp.float32) * s,
        "whh_f": jax.random.normal(ks[2], (H, 4 * H), jnp.float32) * s,
        "b_f":   jax.random.normal(ks[3], (1, 4 * H), jnp.float32) * s,  # b_ih+b_hh
        # backward-direction LSTM weights
        "wih_b": jax.random.normal(ks[4], (E, 4 * H), jnp.float32) * s,
        "whh_b": jax.random.normal(ks[5], (H, 4 * H), jnp.float32) * s,
        "b_b":   jax.random.normal(ks[6], (1, 4 * H), jnp.float32) * s,
        # fc: (2H, C) + (1, C)
        "fc_w":  jax.random.normal(ks[7], (2 * H, C), jnp.float32) * s,
        "fc_b":  jax.random.normal(ks[8], (1, C), jnp.float32) * s,
    }


if __name__ == "__main__":
    # Small shapes consistent with the module's forward.
    B, T = 8, 8            # batch, max_seq_len
    VOCAB = 100            # vocab_size (scaled down from 10000)
    E, H, C = 64, 32, 10   # embedding_dim, hidden_dim, num_classes

    key = jax.random.PRNGKey(0)
    k_tok, k_par = jax.random.split(key)
    tokens = jax.random.randint(k_tok, (B, T), 0, VOCAB, dtype=jnp.int32)
    params = make_params(k_par, VOCAB, E, H, C)

    out = jax.block_until_ready(text_classifier_forward(tokens, params))
    ref = jax.block_until_ready(_reference_forward(tokens, params))

    assert out.shape == (B, C)
    # bf16 matmul operands / bf16 embedding (f32 accumulation) -> loosened tol.
    np.testing.assert_allclose(np.asarray(out), np.asarray(ref),
                               rtol=1e-2, atol=1e-2)
    print("KERNEL_OK")
</pallas_src>

<mosaic_0001>
module attributes {stable_mosaic.version = 11 : i64} {
  func.func @_bilstm_fc_step_kernel(%arg0: i32, %arg1: i32, %arg2: memref<1x8x128xbf16, #tpu.memory_space<vmem>>, %arg3: memref<128x512xbf16, #tpu.memory_space<vmem>>, %arg4: memref<1x512xf32, #tpu.memory_space<vmem>>, %arg5: memref<128x512xbf16, #tpu.memory_space<vmem>>, %arg6: memref<128x512xbf16, #tpu.memory_space<vmem>>, %arg7: memref<1x512xf32, #tpu.memory_space<vmem>>, %arg8: memref<128x128xbf16, #tpu.memory_space<vmem>>, %arg9: memref<128x128xbf16, #tpu.memory_space<vmem>>, %arg10: memref<1x128xf32, #tpu.memory_space<vmem>>, %arg11: memref<8x128xf32, #tpu.memory_space<vmem>>, %arg12: memref<8x128xf32, #tpu.memory_space<vmem>>, %arg13: memref<8x128xf32, #tpu.memory_space<vmem>>) attributes {dimension_semantics = [#tpu.dimension_semantics<parallel>, #tpu.dimension_semantics<arbitrary>], iteration_bounds = array<i64: 1, 8>, scalar_prefetch = 0 : i64, scratch_operands = 2 : i64, tpu.core_type = #tpu.core_type<tc>, window_params = [{transform_indices = @transform_0, window_bounds = array<i64: 1, 8, 128>}, {pipeline_mode = #tpu.pipeline_mode<synchronous>, transform_indices = @transform_1, window_bounds = array<i64: 128, 512>}, {pipeline_mode = #tpu.pipeline_mode<synchronous>, transform_indices = @transform_2, window_bounds = array<i64: 1, 512>}, {pipeline_mode = #tpu.pipeline_mode<synchronous>, transform_indices = @transform_3, window_bounds = array<i64: 128, 512>}, {pipeline_mode = #tpu.pipeline_mode<synchronous>, transform_indices = @transform_4, window_bounds = array<i64: 128, 512>}, {pipeline_mode = #tpu.pipeline_mode<synchronous>, transform_indices = @transform_5, window_bounds = array<i64: 1, 512>}, {pipeline_mode = #tpu.pipeline_mode<synchronous>, transform_indices = @transform_6, window_bounds = array<i64: 128, 128>}, {pipeline_mode = #tpu.pipeline_mode<synchronous>, transform_indices = @transform_7, window_bounds = array<i64: 128, 128>}, {pipeline_mode = #tpu.pipeline_mode<synchronous>, transform_indices = @transform_8, window_bounds = array<i64: 1, 128>}, {transform_indices = @transform_9, window_bounds = array<i64: 8, 128>}]} {
    %c0_i32 = arith.constant 0 : i32
    %0 = arith.cmpi eq, %arg1, %c0_i32 : i32
    %1 = arith.extui %0 : i1 to i32
    %c0_i32_0 = arith.constant 0 : i32
    %2 = arith.cmpi ne, %1, %c0_i32_0 : i32
    scf.if %2 {
      %cst_22 = arith.constant 0.000000e+00 : f32
      %46 = vector.broadcast %cst_22 : f32 to vector<8x128xf32>
      %c0_23 = arith.constant 0 : index
      %c0_24 = arith.constant 0 : index
      %47 = vector.load %arg12[%c0_23, %c0_24] : memref<8x128xf32, #tpu.memory_space<vmem>>, vector<8x128xf32>
      tpu.vector_store %arg12[%c0_23, %c0_24], %46 {strides = array<i32>} : memref<8x128xf32, #tpu.memory_space<vmem>>, vector<8x128xf32>,
      %cst_25 = arith.constant 0.000000e+00 : f32
      %48 = vector.broadcast %cst_25 : f32 to vector<8x128xf32>
      %c0_26 = arith.constant 0 : index
      %c0_27 = arith.constant 0 : index
      %49 = vector.load %arg13[%c0_26, %c0_27] : memref<8x128xf32, #tpu.memory_space<vmem>>, vector<8x128xf32>
      tpu.vector_store %arg13[%c0_26, %c0_27], %48 {strides = array<i32>} : memref<8x128xf32, #tpu.memory_space<vmem>>, vector<8x128xf32>,
    } else {
    }
    %c0 = arith.constant 0 : index
    %c0_1 = arith.constant 0 : index
    %c0_2 = arith.constant 0 : index
    %3 = vector.load %arg2[%c0, %c0_1, %c0_2] : memref<1x8x128xbf16, #tpu.memory_space<vmem>>, vector<1x8x128xbf16>
    %4 = vector.shape_cast %3 : vector<1x8x128xbf16> to vector<8x128xbf16>
    %c0_3 = arith.constant 0 : index
    %c0_4 = arith.constant 0 : index
    %5 = vector.load %arg12[%c0_3, %c0_4] : memref<8x128xf32, #tpu.memory_space<vmem>>, vector<8x128xf32>
    %c0_5 = arith.constant 0 : index
    %c0_6 = arith.constant 0 : index
    %6 = vector.load %arg13[%c0_5, %c0_6] : memref<8x128xf32, #tpu.memory_space<vmem>>, vector<8x128xf32>
    %c0_7 = arith.constant 0 : index
    %c0_8 = arith.constant 0 : index
    %7 = vector.load %arg3[%c0_7, %c0_8] : memref<128x512xbf16, #tpu.memory_space<vmem>>, vector<128x512xbf16>
    %cst = arith.constant dense<0.000000e+00> : vector<8x512xf32>
    %8 = tpu.matmul %4, %7, %cst {dimension_numbers = #tpu.dot_dimension_numbers<[1], [0], [0], [1], [0, 0, 1, 1], [], []>} : vector<8x128xbf16>, vector<128x512xbf16>, vector<8x512xf32> -> vector<8x512xf32>
    %9 = arith.truncf %5 : vector<8x128xf32> to vector<8x128xbf16>
    %c0_9 = arith.constant 0 : index
    %c0_10 = arith.constant 0 : index
    %10 = vector.load %arg5[%c0_9, %c0_10] : memref<128x512xbf16, #tpu.memory_space<vmem>>, vector<128x512xbf16>
    %cst_11 = arith.constant dense<0.000000e+00> : vector<8x512xf32>
    %11 = tpu.matmul %9, %10, %cst_11 {dimension_numbers = #tpu.dot_dimension_numbers<[1], [0], [0], [1], [0, 0, 1, 1], [], []>} : vector<8x128xbf16>, vector<128x512xbf16>, vector<8x512xf32> -> vector<8x512xf32>
    %12 = arith.addf %8, %11 : vector<8x512xf32>
    %c0_12 = arith.constant 0 : index
    %c0_13 = arith.constant 0 : index
    %13 = vector.load %arg4[%c0_12, %c0_13] : memref<1x512xf32, #tpu.memory_space<vmem>>, vector<1x512xf32>
    %14 = vector.broadcast %13 : vector<1x512xf32> to vector<8x512xf32>
    %15 = arith.addf %12, %14 : vector<8x512xf32>
    %16 = vector.extract_strided_slice %15 {offsets = [0, 128], sizes = [8, 128], strides = [1, 1]} : vector<8x512xf32> to vector<8x128xf32>
    %17 = arith.negf %16 : vector<8x128xf32>
    %18 = math.exp %17 : vector<8x128xf32>
    %cst_14 = arith.constant 1.000000e+00 : f32
    %19 = vector.broadcast %cst_14 : f32 to vector<8x128xf32>
    %20 = arith.addf %19, %18 : vector<8x128xf32>
    %21 = arith.divf %19, %20 : vector<8x128xf32>
    %22 = arith.mulf %21, %6 : vector<8x128xf32>
    %23 = vector.extract_strided_slice %15 {offsets = [0, 0], sizes = [8, 128], strides = [1, 1]} : vector<8x512xf32> to vector<8x128xf32>
    %24 = arith.negf %23 : vector<8x128xf32>
    %25 = math.exp %24 : vector<8x128xf32>
    %cst_15 = arith.constant 1.000000e+00 : f32
    %26 = vector.broadcast %cst_15 : f32 to vector<8x128xf32>
    %27 = arith.addf %26, %25 : vector<8x128xf32>
    %28 = arith.divf %26, %27 : vector<8x128xf32>
    %29 = vector.extract_strided_slice %15 {offsets = [0, 256], sizes = [8, 128], strides = [1, 1]} : vector<8x512xf32> to vector<8x128xf32>
    %30 = math.tanh %29 : vector<8x128xf32>
    %31 = arith.mulf %28, %30 : vector<8x128xf32>
    %32 = arith.addf %22, %31 : vector<8x128xf32>
    %33 = vector.extract_strided_slice %15 {offsets = [0, 384], sizes = [8, 128], strides = [1, 1]} : vector<8x512xf32> to vector<8x128xf32>
    %34 = arith.negf %33 : vector<8x128xf32>
    %35 = math.exp %34 : vector<8x128xf32>
    %cst_16 = arith.constant 1.000000e+00 : f32
    %36 = vector.broadcast %cst_16 : f32 to vector<8x128xf32>
    %37 = arith.addf %36, %35 : vector<8x128xf32>
    %38 = arith.divf %36, %37 : vector<8x128xf32>
    %39 = math.tanh %32 : vector<8x128xf32>
    %40 = arith.mulf %38, %39 : vector<8x128xf32>
    %c0_17 = arith.constant 0 : index
    %c0_18 = arith.constant 0 : index
    %41 = vector.load %arg13[%c0_17, %c0_18] : memref<8x128xf32, #tpu.memory_space<vmem>>, vector<8x128xf32>
    tpu.vector_store %arg13[%c0_17, %c0_18], %32 {strides = array<i32>} : memref<8x128xf32, #tpu.memory_space<vmem>>, vector<8x128xf32>,
    %c0_19 = arith.constant 0 : index
    %c0_20 = arith.constant 0 : index
    %42 = vector.load %arg12[%c0_19, %c0_20] : memref<8x128xf32, #tpu.memory_space<vmem>>, vector<8x128xf32>
    tpu.vector_store %arg12[%c0_19, %c0_20], %40 {strides = array<i32>} : memref<8x128xf32, #tpu.memory_space<vmem>>, vector<8x128xf32>,
    %c7_i32 = arith.constant 7 : i32
    %43 = arith.cmpi eq, %arg1, %c7_i32 : i32
    %44 = arith.extui %43 : i1 to i32
    %c0_i32_21 = arith.constant 0 : i32
    %45 = arith.cmpi ne, %44, %c0_i32_21 : i32
    scf.if %45 {
      %c0_22 = arith.constant 0 : index
      %c0_23 = arith.constant 0 : index
      %46 = vector.load %arg6[%c0_22, %c0_23] : memref<128x512xbf16, #tpu.memory_space<vmem>>, vector<128x512xbf16>
      %cst_24 = arith.constant dense<0.000000e+00> : vector<8x512xf32>
      %47 = tpu.matmul %4, %46, %cst_24 {dimension_numbers = #tpu.dot_dimension_numbers<[1], [0], [0], [1], [0, 0, 1, 1], [], []>} : vector<8x128xbf16>, vector<128x512xbf16>, vector<8x512xf32> -> vector<8x512xf32>
      %c0_25 = arith.constant 0 : index
      %c0_26 = arith.constant 0 : index
      %48 = vector.load %arg7[%c0_25, %c0_26] : memref<1x512xf32, #tpu.memory_space<vmem>>, vector<1x512xf32>
      %49 = vector.broadcast %48 : vector<1x512xf32> to vector<8x512xf32>
      %50 = arith.addf %47, %49 : vector<8x512xf32>
      %51 = vector.extract_strided_slice %50 {offsets = [0, 0], sizes = [8, 128], strides = [1, 1]} : vector<8x512xf32> to vector<8x128xf32>
      %52 = arith.negf %51 : vector<8x128xf32>
      %53 = math.exp %52 : vector<8x128xf32>
      %cst_27 = arith.constant 1.000000e+00 : f32
      %54 = vector.broadcast %cst_27 : f32 to vector<8x128xf32>
      %55 = arith.addf %54, %53 : vector<8x128xf32>
      %56 = arith.divf %54, %55 : vector<8x128xf32>
      %57 = vector.extract_strided_slice %50 {offsets = [0, 256], sizes = [8, 128], strides = [1, 1]} : vector<8x512xf32> to vector<8x128xf32>
      %58 = math.tanh %57 : vector<8x128xf32>
      %59 = arith.mulf %56, %58 : vector<8x128xf32>
      %60 = vector.extract_strided_slice %50 {offsets = [0, 384], sizes = [8, 128], strides = [1, 1]} : vector<8x512xf32> to vector<8x128xf32>
      %61 = arith.negf %60 : vector<8x128xf32>
      %62 = math.exp %61 : vector<8x128xf32>
      %cst_28 = arith.constant 1.000000e+00 : f32
      %63 = vector.broadcast %cst_28 : f32 to vector<8x128xf32>
      %64 = arith.addf %63, %62 : vector<8x128xf32>
      %65 = arith.divf %63, %64 : vector<8x128xf32>
      %66 = math.tanh %59 : vector<8x128xf32>
      %67 = arith.mulf %65, %66 : vector<8x128xf32>
      %68 = arith.truncf %40 : vector<8x128xf32> to vector<8x128xbf16>
      %c0_29 = arith.constant 0 : index
      %c0_30 = arith.constant 0 : index
      %69 = vector.load %arg8[%c0_29, %c0_30] : memref<128x128xbf16, #tpu.memory_space<vmem>>, vector<128x128xbf16>
      %cst_31 = arith.constant dense<0.000000e+00> : vector<8x128xf32>
      %70 = tpu.matmul %68, %69, %cst_31 {dimension_numbers = #tpu.dot_dimension_numbers<[1], [0], [0], [1], [0, 0, 1, 1], [], []>} : vector<8x128xbf16>, vector<128x128xbf16>, vector<8x128xf32> -> vector<8x128xf32>
      %71 = arith.truncf %67 : vector<8x128xf32> to vector<8x128xbf16>
      %c0_32 = arith.constant 0 : index
      %c0_33 = arith.constant 0 : index
      %72 = vector.load %arg9[%c0_32, %c0_33] : memref<128x128xbf16, #tpu.memory_space<vmem>>, vector<128x128xbf16>
      %cst_34 = arith.constant dense<0.000000e+00> : vector<8x128xf32>
      %73 = tpu.matmul %71, %72, %cst_34 {dimension_numbers = #tpu.dot_dimension_numbers<[1], [0], [0], [1], [0, 0, 1, 1], [], []>} : vector<8x128xbf16>, vector<128x128xbf16>, vector<8x128xf32> -> vector<8x128xf32>
      %74 = arith.addf %70, %73 : vector<8x128xf32>
      %c0_35 = arith.constant 0 : index
      %c0_36 = arith.constant 0 : index
      %75 = vector.load %arg10[%c0_35, %c0_36] : memref<1x128xf32, #tpu.memory_space<vmem>>, vector<1x128xf32>
      %76 = vector.broadcast %75 : vector<1x128xf32> to vector<8x128xf32>
      %77 = arith.addf %74, %76 : vector<8x128xf32>
      %c0_37 = arith.constant 0 : index
      %c0_38 = arith.constant 0 : index
      %78 = vector.load %arg11[%c0_37, %c0_38] : memref<8x128xf32, #tpu.memory_space<vmem>>, vector<8x128xf32>
      tpu.vector_store %arg11[%c0_37, %c0_38], %77 {strides = array<i32>} : memref<8x128xf32, #tpu.memory_space<vmem>>, vector<8x128xf32>,
    } else {
    }
    return
  }
  func.func @transform_0(%arg0: i32, %arg1: i32) -> (i32, i32, i32) {
    %c0_i32 = arith.constant 0 : i32
    %c0_i32_0 = arith.constant 0 : i32
    return %arg1, %arg0, %c0_i32 : i32, i32, i32
  }
  func.func @transform_1(%arg0: i32, %arg1: i32) -> (i32, i32) {
    %c0_i32 = arith.constant 0 : i32
    %c0_i32_0 = arith.constant 0 : i32
    %c0_i32_1 = arith.constant 0 : i32
    return %c0_i32, %c0_i32_0 : i32, i32
  }
  func.func @transform_2(%arg0: i32, %arg1: i32) -> (i32, i32) {
    %c0_i32 = arith.constant 0 : i32
    %c0_i32_0 = arith.constant 0 : i32
    %c0_i32_1 = arith.constant 0 : i32
    return %c0_i32, %c0_i32_0 : i32, i32
  }
  func.func @transform_3(%arg0: i32, %arg1: i32) -> (i32, i32) {
    %c0_i32 = arith.constant 0 : i32
    %c0_i32_0 = arith.constant 0 : i32
    %c0_i32_1 = arith.constant 0 : i32
    return %c0_i32, %c0_i32_0 : i32, i32
  }
  func.func @transform_4(%arg0: i32, %arg1: i32) -> (i32, i32) {
    %c0_i32 = arith.constant 0 : i32
    %c0_i32_0 = arith.constant 0 : i32
    %c0_i32_1 = arith.constant 0 : i32
    return %c0_i32, %c0_i32_0 : i32, i32
  }
  func.func @transform_5(%arg0: i32, %arg1: i32) -> (i32, i32) {
    %c0_i32 = arith.constant 0 : i32
    %c0_i32_0 = arith.constant 0 : i32
    %c0_i32_1 = arith.constant 0 : i32
    return %c0_i32, %c0_i32_0 : i32, i32
  }
  func.func @transform_6(%arg0: i32, %arg1: i32) -> (i32, i32) {
    %c0_i32 = arith.constant 0 : i32
    %c0_i32_0 = arith.constant 0 : i32
    %c0_i32_1 = arith.constant 0 : i32
    return %c0_i32, %c0_i32_0 : i32, i32
  }
  func.func @transform_7(%arg0: i32, %arg1: i32) -> (i32, i32) {
    %c0_i32 = arith.constant 0 : i32
    %c0_i32_0 = arith.constant 0 : i32
    %c0_i32_1 = arith.constant 0 : i32
    return %c0_i32, %c0_i32_0 : i32, i32
  }
  func.func @transform_8(%arg0: i32, %arg1: i32) -> (i32, i32) {
    %c0_i32 = arith.constant 0 : i32
    %c0_i32_0 = arith.constant 0 : i32
    %c0_i32_1 = arith.constant 0 : i32
    return %c0_i32, %c0_i32_0 : i32, i32
  }
  func.func @transform_9(%arg0: i32, %arg1: i32) -> (i32, i32) {
    %c0_i32 = arith.constant 0 : i32
    %c0_i32_0 = arith.constant 0 : i32
    return %arg0, %c0_i32 : i32, i32
  }
}

</mosaic_0001>

<bundles_post_ra>
// kernel: tpu_custom_call.1
= control target key start
LH: loop header
LB: loop body
LE: loop exit
PB: predicated region body
PF: predicated region fallthrough
CT: control target
= control target key end

     0   :  { %s2879_s0 = inlined_call_operand.hbm [shape: bf16[8,8,128], index: 0, kind: input, shape index: {}]   ;;  %s2880_s1 = inlined_call_operand.hbm [shape: bf16[128,512], index: 1, kind: input, shape index: {}]   ;;  %s2881_s2 = inlined_call_operand.vmem [shape: f32[1,512], index: 2, kind: input, shape index: {}]   ;;  %s2882_s3 = inlined_call_operand.hbm [shape: bf16[128,512], index: 3, kind: input, shape index: {}]   ;;  %s2883_s4 = inlined_call_operand.hbm [shape: bf16[128,512], index: 4, kind: input, shape index: {}]   ;;  %s2884_s5 = inlined_call_operand.vmem [shape: f32[1,512], index: 5, kind: input, shape index: {}]   ;;  %s2885_s6 = inlined_call_operand.hbm [shape: bf16[128,128], index: 6, kind: input, shape index: {}]   ;;  %s2886_s7 = inlined_call_operand.hbm [shape: bf16[128,128], index: 7, kind: input, shape index: {}]   ;;  %s2887_s8 = inlined_call_operand.vmem [shape: f32[1,128], index: 8, kind: input, shape index: {}]   ;;  %s2888_s9 = inlined_call_operand.hbm [shape: f32[8,128], index: 9, kind: output, shape index: {}]  }
   0x1   :  { %2894 = sst [smem:[#allocation21_spill]] %s2884_s5 }
   0x2   :  { %2895 = sst [smem:[#allocation22_spill]] %s2887_s8 }
   0x3   :  { %2896 = sst [smem:[#allocation23_spill]] %s2888_s9 }
   0x4   :  { %14 = vsyncpa [#allocation5], 0 }
   0x5   :  { %16 = vsyncpa [#allocation5 + $0x1], 0 }
   0x6   :  { %17 = vsyncpa [#allocation8], 0 }
   0x7   :  { %18 = vsyncpa [#allocation11], 0 }
   0x8   :  { %19 = vsyncpa [#allocation14], 0 }
   0x9   :  { %20 = vsyncpa [#allocation6], 0  ;;  %s2527_s30 = smov 0   ;;  %s2529_s10 = smov 0  }
   0xa   :  { %s2531_s11 = smov 0   ;;  %s2533_s12 = smov 0  }
   0xb   :  { %s2535_s13 = smov 0   ;;  %s2537_s14 = smov 0  }
   0xc LB: > { %s2889_s15 = sadd.s32 4294967295, %s2459_s14   ;;  %p1689_p0 = scmp.ge.s32.totalorder %s2459_s14, 1  ;;  %s2459_s14 = sphi %s2537_s14, %s26_s14   ;;  %s2455_s13 = sphi %s2535_s13, %s2916_s13   ;;  %s2451_s12 = sphi %s2533_s12, %s2915_s12   ;;  %s2447_s11 = sphi %s2531_s11, %s2914_s11   ;;  %s2443_s10 = sphi %s2529_s10, %s2913_s10   ;;  %s2439_s30 = sphi %s2527_s30, %s2912_s30  }
   0xd   : > { %p2561_p1 = scmp.eq.s32.totalorder %s2889_s15, 0  ;;  %p265_p2 = scmp.lt.s32.totalorder %s2459_s14, 9 }
   0xe   : > { %s2461_s18 = smov [#allocation7]   ;;  %s2462_s21 = smov [#allocation10]  }
   0xf   : > { %s2897_s16 = scalar_select %p2561_p1, 1, 0 }
  0x10   : > { %p2566_p3 = pnand %p1689_p0, %p265_p2  ;;  %s277_s19 = sshll.u32 %s2461_s18, 4  ;;  %s2570_s19 = int_to_ptr.vmem [resolvable:$true] %s277_s19 }
  0x11   : > { %s306_s22 = sshll.u32 %s2462_s21, 4  ;;  %s2463_s23 = smov [#allocation9]   ;;  %s2580_s22 = int_to_ptr.vmem [resolvable:$true] %s306_s22 }
  0x12   : > { %s2898_s17 = scalar_select %p2566_p3, 1, 0 }
  0x13   : > { %p1913_p4 = pneg %p2566_p3  ;;  %s2582_s24 = sshll.u32 %s2463_s23, 4  ;;  %s294_s24 = int_to_ptr.vmem [resolvable:$true] %s2582_s24 }
  0x14   : > { %s2197_s27 = scalar_lea.hbm %s2880_s1, 4096 }
  0x15   : > { %p2576_p5 = pnand %p1913_p4, %p2561_p1  ;;  %p2198_p6 = scmp.ne.s32.totalorder %s2880_s1, %s2197_s27 }
  0x16   : > { %p2204_p10 = scmp.lt.u32.totalorder %s2197_s27, %s2880_s1 }
  0x17   : > { %p2592_p7 = pneg %p2576_p5 }
  0x19   : > { %p2200_p8 = pnand %p2592_p7, %p2198_p6 }
  0x1b   : > { %p2201_p9 = pneg %p2200_p8 }
  0x1d   : > { %p2206_p11 = pnand %p2204_p10, %p2201_p9 }
  0x1f   : > { %2209 = shalt.err (!%p2206_p11)
}
  0x20   : > { %s2210_s25 = scalar_lea.vmem %s2570_s19, 4096  ;;  %p2218_p2 = scmp.lt.s32.totalorder %s2570_s19, %s2570_s19 }
  0x21   : > { %p2211_p12 = scmp.ne.s32.totalorder %s2570_s19, %s2210_s25  ;;  %p2219_p4 = scmp.lt.s32.totalorder %s2210_s25, %s2210_s25 }
  0x23   : > { %p2213_p13 = pnand %p2211_p12, %p2592_p7  ;;  %p2220_p6 = por %p2219_p4, %p2218_p2 }
  0x25   : > { %p2214_p0 = pneg %p2213_p13 }
  0x27   : > { %p2221_p8 = pnand %p2220_p6, %p2214_p0 }
  0x29   : > { %2224 = shalt.err (!%p2221_p8)
}
  0x2a   : > { %s2464_s26 = smov 256   ;;  %s2465_s27 = smov 16  }
  0x2b   : > { %1916 = dma.hbm_to_vmem [thread:$0]  (!%p2576_p5), %s2880_s1, 4096, %s2570_s19, [#allocation8], %s2464_s26, %s2464_s26, %s2465_s27  }
  0x2c   : > { %s2225_s25 = scalar_lea.hbm %s2883_s4, 4096 }
  0x2d   : > { %p2226_p9 = scmp.ne.s32.totalorder %s2883_s4, %s2225_s25  ;;  %p2232_p12 = scmp.lt.u32.totalorder %s2225_s25, %s2883_s4 }
  0x2f   : > { %p2228_p10 = pnand %p2226_p9, %p2592_p7 }
  0x31   : > { %p2229_p11 = pneg %p2228_p10 }
  0x33   : > { %p2234_p13 = pnand %p2232_p12, %p2229_p11 }
  0x35   : > { %2237 = shalt.err (!%p2234_p13)
}
  0x36   : > { %s2238_s19 = scalar_lea.vmem %s2580_s22, 4096  ;;  %p2246_p6 = scmp.lt.s32.totalorder %s2580_s22, %s2580_s22 }
  0x37   : > { %p2239_p0 = scmp.ne.s32.totalorder %s2580_s22, %s2238_s19  ;;  %p2247_p8 = scmp.lt.s32.totalorder %s2238_s19, %s2238_s19 }
  0x39   : > { %p2241_p2 = pnand %p2239_p0, %p2592_p7  ;;  %p2248_p9 = por %p2247_p8, %p2246_p6 }
  0x3b   : > { %p2242_p4 = pneg %p2241_p2 }
  0x3d   : > { %p2249_p10 = pnand %p2248_p9, %p2242_p4 }
  0x3f   : > { %2252 = shalt.err (!%p2249_p10)
}
  0x40   : > { %1922 = dma.hbm_to_vmem [thread:$0]  (!%p2576_p5), %s2883_s4, 4096, %s2580_s22, [#allocation11], %s2464_s26, %s2464_s26, %s2465_s27  }
  0x41   : > { %s2253_s28 = scalar_lea.hbm %s2882_s3, 4096 }
  0x42   : > { %p2254_p11 = scmp.ne.s32.totalorder %s2882_s3, %s2253_s28  ;;  %p2260_p0 = scmp.lt.u32.totalorder %s2253_s28, %s2882_s3 }
  0x44   : > { %p2256_p12 = pnand %p2254_p11, %p2592_p7 }
  0x46   : > { %p2257_p13 = pneg %p2256_p12 }
  0x48   : > { %p2262_p2 = pnand %p2260_p0, %p2257_p13 }
  0x4a   : > { %2265 = shalt.err (!%p2262_p2)
}
  0x4b   : > { %s2266_s19 = scalar_lea.vmem %s294_s24, 4096  ;;  %p2274_p9 = scmp.lt.s32.totalorder %s294_s24, %s294_s24 }
  0x4c   : > { %p2267_p4 = scmp.ne.s32.totalorder %s294_s24, %s2266_s19  ;;  %p2275_p10 = scmp.lt.s32.totalorder %s2266_s19, %s2266_s19 }
  0x4e   : > { %p2269_p6 = pnand %p2267_p4, %p2592_p7  ;;  %p2276_p3 = por %p2275_p10, %p2274_p9 }
  0x50   : > { %p2270_p8 = pneg %p2269_p6 }
  0x52   : > { %p2277_p1 = pnand %p2276_p3, %p2270_p8 }
  0x54   : > { %2280 = shalt.err (!%p2277_p1)
}
  0x55   : > { %1919 = dma.hbm_to_vmem [thread:$0]  (!%p2576_p5), %s2882_s3, 4096, %s294_s24, [#allocation8], %s2464_s26, %s2464_s26, %s2465_s27  }
  0x56   : > { %s2466_s8 = smov [#allocation12]   ;;  %s2281_s29 = scalar_lea.hbm %s2885_s6, 1024 }
  0x57   : > { %s322_s9 = sshll.u32 %s2466_s8, 4  ;;  %p2282_p1 = scmp.ne.s32.totalorder %s2885_s6, %s2281_s29  ;;  %s323_s9 = int_to_ptr.vmem [resolvable:$true] %s322_s9 }
  0x58   : > { %p2288_p12 = scmp.lt.u32.totalorder %s2281_s29, %s2885_s6 }
  0x59   : > { %p2284_p3 = pnand %p2282_p1, %p2592_p7 }
  0x5b   : > { %p2285_p11 = pneg %p2284_p3 }
  0x5d   : > { %p2290_p13 = pnand %p2288_p12, %p2285_p11 }
  0x5f   : > { %2293 = shalt.err (!%p2290_p13)
}
  0x60   : > { %s2294_s24 = scalar_lea.vmem %s323_s9, 1024  ;;  %p2302_p6 = scmp.lt.s32.totalorder %s323_s9, %s323_s9 }
  0x61   : > { %p2295_p0 = scmp.ne.s32.totalorder %s323_s9, %s2294_s24  ;;  %p2303_p8 = scmp.lt.s32.totalorder %s2294_s24, %s2294_s24 }
  0x63   : > { %p2297_p2 = pnand %p2295_p0, %p2592_p7  ;;  %p2304_p9 = por %p2303_p8, %p2302_p6 }
  0x65   : > { %p2298_p4 = pneg %p2297_p2 }
  0x67   : > { %p2305_p10 = pnand %p2304_p9, %p2298_p4 }
  0x69   : > { %2308 = shalt.err (!%p2305_p10)
}
  0x6a   : > { %s2467_s26 = smov 64   ;;  %s2468_s27 = smov 4  }
  0x6b   : > { %1925 = dma.hbm_to_vmem [thread:$0]  (!%p2576_p5), %s2885_s6, 1024, %s323_s9, [#allocation11], %s2467_s26, %s2467_s26, %s2468_s27  }
  0x6c   : > { %s2469_s8 = smov [#allocation13]   ;;  %s2309_s21 = scalar_lea.hbm %s2886_s7, 1024 }
  0x6d   : > { %s335_s15 = sshll.u32 %s2469_s8, 4  ;;  %p2310_p1 = scmp.ne.s32.totalorder %s2886_s7, %s2309_s21  ;;  %s336_s15 = int_to_ptr.vmem [resolvable:$true] %s335_s15 }
  0x6e   : > { %p2316_p12 = scmp.lt.u32.totalorder %s2309_s21, %s2886_s7 }
  0x6f   : > { %p2312_p3 = pnand %p2310_p1, %p2592_p7 }
  0x71   : > { %p2313_p11 = pneg %p2312_p3 }
  0x73   : > { %p2318_p13 = pnand %p2316_p12, %p2313_p11 }
  0x75   : > { %2321 = shalt.err (!%p2318_p13)
}
  0x76   : > { %s2322_s9 = scalar_lea.vmem %s336_s15, 1024  ;;  %p2330_p6 = scmp.lt.s32.totalorder %s336_s15, %s336_s15 }
  0x77   : > { %p2323_p0 = scmp.ne.s32.totalorder %s336_s15, %s2322_s9  ;;  %p2331_p8 = scmp.lt.s32.totalorder %s2322_s9, %s2322_s9 }
  0x79   : > { %p2325_p2 = pnand %p2323_p0, %p2592_p7  ;;  %p2332_p9 = por %p2331_p8, %p2330_p6 }
  0x7b   : > { %p2326_p4 = pneg %p2325_p2 }
  0x7d   : > { %p2333_p10 = pnand %p2332_p9, %p2326_p4 }
  0x7f   : > { %2336 = shalt.err (!%p2333_p10)
}
  0x80   : > { %1928 = dma.hbm_to_vmem [thread:$0]  (!%p2576_p5), %s2886_s7, 1024, %s336_s15, [#allocation14], %s2467_s26, %s2467_s26, %s2468_s27  }
  0x81   : > { %s35_s18 = sadd.s32 1, %s2455_s13  ;;  %s47_s20 = sadd.s32 1, %s2447_s11 }
  0x82   : > { %p36_p7 = scmp.ge.s32.totalorder %s35_s18, 8  ;;  %p54_p1 = scmp.ne.s32.totalorder %s2447_s11, %s2443_s10 }
  0x83   : > { %p55_p3 = scmp.eq.s32.totalorder %s2459_s14, 0  ;;  %p60_p12 = scmp.ne.s32.totalorder %s2443_s10, %s2439_s30 }
  0x84   : > { %s2918_s18 = smov (%p36_p7, %s35_s18), 0  ;;  %p1938_p13 = scmp.lt.s32.totalorder %s2459_s14, 8 }
  0x85   : > { %p2707_p11 = por %p55_p3, %p54_p1  ;;  %s42_s28 = ssub.s32 %s2455_s13, %s2918_s18 }
  0x86   : > { %p45_p0 = scmp.eq.s32.totalorder %s42_s28, 0  ;;  %p2902_p2 = scmp.ne.s32.totalorder %s2897_s16, 0 }
  0x87   : > { %s352_s27 = sand.u32 1, %s2447_s11   ;;  %s1697_s15 = sshll.u32 %s2455_s13, 6 }
  0x88   : > { %p2718_p4 = por %p2902_p2, %p60_p12  ;;  %s1696_s21 = sshll.u32 %s352_s27, 2 }
  0x89   : > { %s2725_s29 = scalar_select %p45_p0, %s2447_s11, %s47_s20  }
  0x8a   : > { %s2730_s19 = scalar_lea.hbm %s2879_s0, %s1697_s15  ;;  %s356_s30 = scalar_lea.vmem [#allocation4], %s1696_s21 }
  0x8b   : > { %s364_s24 = sshll.u32 %s356_s30, 4  ;;  %p2734_p5 = pnand %p1938_p13, %p2707_p11  ;;  %s2738_s24 = int_to_ptr.vmem [resolvable:$true] %s364_s24 }
  0x8c   : > { %s353_s22 = scalar_lea.sflag [#allocation5], %s352_s27  ;;  %s2337_s5 = scalar_lea.hbm %s2730_s19, 64 }
  0x8d   : > { %p2338_p6 = scmp.ne.s32.totalorder %s2730_s19, %s2337_s5  ;;  %p2339_p8 = pneg %p2734_p5 }
  0x8e   : > { %s2342_s8 = scalar_lea.hbm %s2879_s0, 512  ;;  %p2343_p7 = scmp.lt.u32.totalorder %s2730_s19, %s2879_s0 }
  0x8f   : > { %p2340_p9 = pnand %p2339_p8, %p2338_p6  ;;  %p2344_p1 = scmp.lt.u32.totalorder %s2342_s8, %s2337_s5 }
  0x90   : > { %p2346_p11 = scmp.lt.u32.totalorder %s2337_s5, %s2730_s19 }
  0x91   : > { %p2341_p10 = pneg %p2340_p9  ;;  %p2345_p3 = por %p2344_p1, %p2343_p7 }
  0x93   : > { %p2347_p12 = por %p2346_p11, %p2345_p3 }
  0x95   : > { %p2348_p13 = pnand %p2347_p12, %p2341_p10 }
  0x97   : > { %2351 = shalt.err (!%p2348_p13)
}
  0x98   : > { %s2352_s27 = scalar_lea.vmem %s2738_s24, 64  ;;  %s2470_s23 = smov [#allocation4]  }
  0x99   : > { %p2353_p0 = scmp.ne.s32.totalorder %s2738_s24, %s2352_s27  ;;  %s2357_s25 = sshll.u32 %s2470_s23, 4  ;;  %s2358_s25 = int_to_ptr.vmem [resolvable:$false] %s2357_s25 }
  0x9a   : > { %s2359_s30 = scalar_lea.vmem %s2358_s25, 128  ;;  %p2360_p9 = scmp.lt.s32.totalorder %s2738_s24, %s2358_s25 }
  0x9b   : > { %p2355_p2 = pnand %p2353_p0, %p2339_p8  ;;  %p2361_p7 = scmp.lt.s32.totalorder %s2359_s30, %s2352_s27 }
  0x9d   : > { %p2356_p6 = pneg %p2355_p2  ;;  %p2362_p1 = por %p2361_p7, %p2360_p9 }
  0x9f   : > { %p2363_p3 = pnand %p2362_p1, %p2356_p6 }
  0xa1   : > { %2366 = shalt.err (!%p2363_p3)
}
  0xa2   : > { %1932 = dma.hbm_to_vmem [thread:$0]  (!%p2734_p5), %s2730_s19, 64, %s2738_s24, %s353_s22  }
  0xa3   : > { %p2905_p10 = scmp.ne.s32.totalorder %s2898_s17, 0 }
  0xa4   : > { %s375_s5 = sand.u32 (!%p2905_p10), 1, %s2443_s10  }
  0xa5   : > { %373 = sbr.rel (%p2905_p10) target bundleno = 994 (0x3e2), region = 56  ;;  %s2768_s20 = sshll.u32 (!%p2905_p10), %s375_s5, 2 }
  0xa6   : > { %s376_s28 = scalar_lea.sflag (!%p2905_p10), [#allocation5], %s375_s5  ;;  %s379_s8 = scalar_lea.vmem (!%p2905_p10), [#allocation4], %s2768_s20 }
  0xac   : > { %2418 = dma.done.wait (%p2718_p4), %s376_s28, 64  }
  0xad   : > { %2420 = vsyncadd (%p2718_p4), %s376_s28, 4294967232  ;;  %p2906_p8 = scmp.ne.s32.totalorder %s2897_s16, 0 }
  0xaf   : > { %2422 = dma.done.wait (%p2906_p8), [#allocation8], 8192  }
  0xb0   : > { %2424 = vsyncadd (%p2906_p8), [#allocation8], 4294959104 }
  0xb1   : > { %2426 = dma.done.wait (%p2906_p8), [#allocation11], 5120  }
  0xb2   : > { %2428 = vsyncadd (%p2906_p8), [#allocation11], 4294962176 }
  0xb3   : > { %2430 = dma.done.wait (%p2906_p8), [#allocation14], 1024  }
  0xb4   : > { %2432 = vsyncadd (%p2906_p8), [#allocation14], 4294966272  ;;  %p1705_p4 = scmp.ne.s32.totalorder %s2451_s12, 0 }
  0xb5   : > { %v2471_v0 = vmov (!%p1705_p4), 0.0  }
  0xb6   : > { %433 = sbr.rel (%p1705_p4) target bundleno = 189 (0xbd), region = 84  ;;  %434 = vst [vmem:[#allocation2] sm:$0xff] (!%p1705_p4), %v2471_v0  ;;  %435 = vst [vmem:[#allocation3] sm:$0xff] (!%p1705_p4), %v2471_v0 }
  0xbd PF: > { %v2009_v1 = vld [vmem:[#allocation9 + $0x4] ss:$16 sps:$4 sm:$0xff]   ;;  %v2011_v2 = vld [vmem:[#allocation9 + $0xc] ss:$16 sps:$4 sm:$0xff]   ;;  %v2472_v3 = vmov 0   ;;  %p1773_p5 = scmp.ne.s32.totalorder %s2451_s12, 7 }
  0xbe   : > { %696 = vmatprep.mubr.bf16.mxu0 %v2472_v3  ;;  %737 = vmatprep.mubr.bf16.mxu1 %v2472_v3  ;;  %v2013_v4 = vld [vmem:[#allocation9] ss:$16 sps:$4 sm:$0xff]   ;;  %v2014_v5 = vld [vmem:[#allocation9 + $0x8] ss:$16 sps:$4 sm:$0xff]   ;;  %v2015_v6 = vld [vmem:[#allocation9 + $0x24] ss:$16 sps:$4 sm:$0xff]  }
  0xbf   : > { %664 = vmatprep.subr.bf16.mxu0 %v2009_v1  ;;  %705 = vmatprep.subr.bf16.mxu1 %v2011_v2  ;;  %v2017_v7 = vld [vmem:[#allocation9 + $0x2c] ss:$16 sps:$4 sm:$0xff]   ;;  %v2019_v8 = vld [vmem:[#allocation9 + $0x20] ss:$16 sps:$4 sm:$0xff]   ;;  %v2020_v9 = vld [vmem:[#allocation9 + $0x28] ss:$16 sps:$4 sm:$0xff]  }
  0xc0   : > { %665 = vmatpush1.bf16.msra.mxu0 %v2013_v4  ;;  %706 = vmatpush1.bf16.msra.mxu1 %v2014_v5  ;;  %v2021_v10 = vld [vmem:[#allocation9 + $0x44] ss:$16 sps:$4 sm:$0xff]   ;;  %v2023_v11 = vld [vmem:[#allocation9 + $0x4c] ss:$16 sps:$4 sm:$0xff]   ;;  %v2025_v12 = vld [vmem:[#allocation9 + $0x40] ss:$16 sps:$4 sm:$0xff]  }
  0xc1   : > { %666 = vmatprep.subr.bf16.mxu0 %v2015_v6  ;;  %707 = vmatprep.subr.bf16.mxu1 %v2017_v7  ;;  %v2026_v13 = vld [vmem:[#allocation9 + $0x48] ss:$16 sps:$4 sm:$0xff]   ;;  %v2027_v14 = vld [vmem:[#allocation9 + $0x64] ss:$16 sps:$4 sm:$0xff]   ;;  %v2029_v15 = vld [vmem:[#allocation9 + $0x6c] ss:$16 sps:$4 sm:$0xff]  }
  0xc2   : > { %v2031_v16 = vld [vmem:[#allocation9 + $0x60] ss:$16 sps:$4 sm:$0xff]   ;;  %v2032_v17 = vld [vmem:[#allocation9 + $0x68] ss:$16 sps:$4 sm:$0xff]   ;;  %v2033_v18 = vld [vmem:[#allocation9 + $0x84] ss:$16 sps:$4 sm:$0xff]  }
  0xc3   : > { %v2035_v19 = vld [vmem:[#allocation9 + $0x8c] ss:$16 sps:$4 sm:$0xff]   ;;  %v2037_v20 = vld [vmem:[#allocation9 + $0x80] ss:$16 sps:$4 sm:$0xff]   ;;  %v2038_v21 = vld [vmem:[#allocation9 + $0x88] ss:$16 sps:$4 sm:$0xff]  }
  0xc4   : > { %667 = vmatpush1.bf16.msra.mxu0 %v2019_v8  ;;  %708 = vmatpush1.bf16.msra.mxu1 %v2020_v9  ;;  %v2039_v22 = vld [vmem:[#allocation9 + $0xa4] ss:$16 sps:$4 sm:$0xff]   ;;  %v2041_v23 = vld [vmem:[#allocation9 + $0xac] ss:$16 sps:$4 sm:$0xff]   ;;  %v2043_v24 = vld [vmem:[#allocation9 + $0xa0] ss:$16 sps:$4 sm:$0xff]  }
  0xc5   : > { %668 = vmatprep.subr.bf16.mxu0 %v2021_v10  ;;  %709 = vmatprep.subr.bf16.mxu1 %v2023_v11  ;;  %v2044_v25 = vld [vmem:[#allocation9 + $0xa8] ss:$16 sps:$4 sm:$0xff]   ;;  %v2045_v26 = vld [vmem:[#allocation9 + $0xc4] ss:$16 sps:$4 sm:$0xff]   ;;  %v2047_v27 = vld [vmem:[#allocation9 + $0xcc] ss:$16 sps:$4 sm:$0xff]  }
  0xc6   : > { %v2049_v28 = vld [vmem:[#allocation9 + $0xc0] ss:$16 sps:$4 sm:$0xff]   ;;  %v2050_v29 = vld [vmem:[#allocation9 + $0xc8] ss:$16 sps:$4 sm:$0xff]   ;;  %v2051_v30 = vld [vmem:[#allocation9 + $0xe4] ss:$16 sps:$4 sm:$0xff]  }
  0xc7   : > { %v2053_v31 = vld [vmem:[#allocation9 + $0xec] ss:$16 sps:$4 sm:$0xff]   ;;  %v2055_v32 = vld [vmem:[#allocation9 + $0xe0] ss:$16 sps:$4 sm:$0xff]   ;;  %v2056_v33 = vld [vmem:[#allocation9 + $0xe8] ss:$16 sps:$4 sm:$0xff]  }
  0xc8   : > { %669 = vmatpush1.bf16.msra.mxu0 %v2025_v12  ;;  %710 = vmatpush1.bf16.msra.mxu1 %v2026_v13  ;;  %v437_v34 = vld [vmem:[#allocation2] sm:$0xff]  ;;  %v2059_v35 = vld [vmem:[#allocation7 + $0x4] ss:$16 sps:$4 sm:$0xff]   ;;  %v2057_v38 = vld [vmem:[#allocation7] ss:$16 sps:$4 sm:$0xff]   ;;  %v990_v13 = vlaneseq  ;;  %vm2475_vm0 = vmmov (!%p1773_p5), 0  }
  0xc9   : > { %670 = vmatprep.subr.bf16.mxu0 %v2027_v14  ;;  %711 = vmatprep.subr.bf16.mxu1 %v2029_v15  ;;  %v2062_v36 = vld [vmem:[#allocation7 + $0xc] ss:$16 sps:$4 sm:$0xff]   ;;  %v471_v37 = vpack.c.bf16 %v437_v34, %v437_v34  ;;  %v2060_v39 = vld [vmem:[#allocation7 + $0x8] ss:$16 sps:$4 sm:$0xff]   ;;  %v2065_v40 = vld [vmem:[#allocation7 + $0x24] ss:$16 sps:$4 sm:$0xff]  }
  0xca   : > { %v2068_v41 = vld [vmem:[#allocation7 + $0x2c] ss:$16 sps:$4 sm:$0xff]   ;;  %v2063_v42 = vld [vmem:[#allocation7 + $0x20] ss:$16 sps:$4 sm:$0xff]   ;;  %v2066_v43 = vld [vmem:[#allocation7 + $0x28] ss:$16 sps:$4 sm:$0xff]  }
  0xcb   : > { %v2071_v44 = vld [vmem:[#allocation7 + $0x44] ss:$16 sps:$4 sm:$0xff]   ;;  %v2074_v45 = vld [vmem:[#allocation7 + $0x4c] ss:$16 sps:$4 sm:$0xff]   ;;  %v2069_v46 = vld [vmem:[#allocation7 + $0x40] ss:$16 sps:$4 sm:$0xff]  }
  0xcc   : > { %671 = vmatpush1.bf16.msra.mxu0 %v2031_v16  ;;  %712 = vmatpush1.bf16.msra.mxu1 %v2032_v17  ;;  %v2072_v47 = vld [vmem:[#allocation7 + $0x48] ss:$16 sps:$4 sm:$0xff]   ;;  %v2077_v48 = vld [vmem:[#allocation7 + $0x64] ss:$16 sps:$4 sm:$0xff]   ;;  %v2080_v49 = vld [vmem:[#allocation7 + $0x6c] ss:$16 sps:$4 sm:$0xff]  }
  0xcd   : > { %672 = vmatprep.subr.bf16.mxu0 %v2033_v18  ;;  %713 = vmatprep.subr.bf16.mxu1 %v2035_v19  ;;  %v2075_v50 = vld [vmem:[#allocation7 + $0x60] ss:$16 sps:$4 sm:$0xff]   ;;  %v2078_v51 = vld [vmem:[#allocation7 + $0x68] ss:$16 sps:$4 sm:$0xff]   ;;  %v2083_v52 = vld [vmem:[#allocation7 + $0x84] ss:$16 sps:$4 sm:$0xff]  }
  0xce   : > { %v2086_v53 = vld [vmem:[#allocation7 + $0x8c] ss:$16 sps:$4 sm:$0xff]   ;;  %v2081_v54 = vld [vmem:[#allocation7 + $0x80] ss:$16 sps:$4 sm:$0xff]   ;;  %v2084_v55 = vld [vmem:[#allocation7 + $0x88] ss:$16 sps:$4 sm:$0xff]  }
  0xcf   : > { %v2089_v56 = vld [vmem:[#allocation7 + $0xa4] ss:$16 sps:$4 sm:$0xff]   ;;  %v2092_v57 = vld [vmem:[#allocation7 + $0xac] ss:$16 sps:$4 sm:$0xff]   ;;  %v2087_v58 = vld [vmem:[#allocation7 + $0xa0] ss:$16 sps:$4 sm:$0xff]  }
  0xd0   : > { %673 = vmatpush1.bf16.msra.mxu0 %v2037_v20  ;;  %714 = vmatpush1.bf16.msra.mxu1 %v2038_v21  ;;  %v2090_v59 = vld [vmem:[#allocation7 + $0xa8] ss:$16 sps:$4 sm:$0xff]   ;;  %v2095_v60 = vld [vmem:[#allocation7 + $0xc4] ss:$16 sps:$4 sm:$0xff]   ;;  %v2098_v61 = vld [vmem:[#allocation7 + $0xcc] ss:$16 sps:$4 sm:$0xff]  }
  0xd1   : > { %674 = vmatprep.subr.bf16.mxu0 %v2039_v22  ;;  %715 = vmatprep.subr.bf16.mxu1 %v2041_v23  ;;  %v2093_v62 = vld [vmem:[#allocation7 + $0xc0] ss:$16 sps:$4 sm:$0xff]   ;;  %v2096_v63 = vld [vmem:[#allocation7 + $0xc8] ss:$16 sps:$4 sm:$0xff]   ;;  %v2101_v0 = vld [vmem:[#allocation7 + $0xe4] ss:$16 sps:$4 sm:$0xff]  }
  0xd2   : > { %v2104_v1 = vld [vmem:[#allocation7 + $0xec] ss:$16 sps:$4 sm:$0xff]   ;;  %v2099_v2 = vld [vmem:[#allocation7 + $0xe0] ss:$16 sps:$4 sm:$0xff]   ;;  %v2798_v14 = vshrl.u32 %v990_v13, 7  ;;  %s2907_s19 = sld [smem:[#allocation21_spill]] (!%p1773_p5) }
  0xd3   : > { %v2794_v4 = vld [vmem:[%s379_s8] sm:$0xf]  ;;  %v988_v16 = vld [vmem:[%s2881_s2] sm:$0xf]  ;;  %v2141_v13 = vld [vmem:[#allocation10 + $0x80] ss:$16 sps:$4 sm:$0xff] (!%p1773_p5)  }
  0xd4   : > { %675 = vmatpush1.bf16.msra.mxu0 %v2043_v24  ;;  %716 = vmatpush1.bf16.msra.mxu1 %v2044_v25  ;;  %v992_v15 = vsub.s32 0, %v2798_v14  ;;  %v996_v17 = vsub.s32 1, %v2798_v14  ;;  %s2908_s22 = sld [smem:[#allocation22_spill]] (!%p1773_p5) }
  0xd5   : > { %676 = vmatprep.subr.bf16.mxu0 %v2045_v26  ;;  %717 = vmatprep.subr.bf16.mxu1 %v2047_v27 }
  0xd6   : > { %v993_v18 = vrot.slane %v988_v16, %v992_v15  ;;  %v997_v21 = vrot.slane %v988_v16, %v996_v17  ;;  %v2150_v17 = vld [vmem:[#allocation10 + $0x68] ss:$16 sps:$4 sm:$0xff] (!%p1773_p5)  }
  0xd8   : > { %677 = vmatpush1.bf16.msra.mxu0 %v2049_v28  ;;  %718 = vmatpush1.bf16.msra.mxu1 %v2050_v29  ;;  %v1004_v28 = vsub.s32 3, %v2798_v14 }
  0xd9   : > { %678 = vmatprep.subr.bf16.mxu0 %v2051_v30  ;;  %719 = vmatprep.subr.bf16.mxu1 %v2053_v31 }
  0xdc   : > { %679 = vmatpush1.bf16.msra.mxu0 %v2055_v32  ;;  %720 = vmatpush1.bf16.msra.mxu1 %v2056_v33 }
  0xdd   : > { %906 = vmatprep.subr.bf16.mxu0 %v2059_v35  ;;  %947 = vmatprep.subr.bf16.mxu1 %v2062_v36 }
  0xdf   : > { %697 = vmatmul.mubr.bf16.vlgmr.msra.gmra.mrb[0].mxu0 %v471_v37  ;;  %738 = vmatmul.mubr.bf16.vlgmr.msra.gmra.mrb[0].mxu1 %v471_v37  ;;  %v1005_v37 = vrot.slane %v988_v16, %v1004_v28 }
  0xe0   : > { %907 = vmatpush1.bf16.msra.mxu0 %v2057_v38  ;;  %948 = vmatpush1.bf16.msra.mxu1 %v2060_v39  ;;  %v1000_v38 = vsub.s32 2, %v2798_v14 }
  0xe1   : > { %908 = vmatprep.subr.bf16.mxu0 %v2065_v40  ;;  %949 = vmatprep.subr.bf16.mxu1 %v2068_v41 }
  0xe2   : > { %938 = vmatprep.mubr.bf16.mxu0 %v2472_v3  ;;  %979 = vmatprep.mubr.bf16.mxu1 %v2472_v3  ;;  %v2102_v3 = vld [vmem:[#allocation7 + $0xe8] ss:$16 sps:$4 sm:$0xff]   ;;  %v1001_v40 = vrot.slane %v988_v16, %v1000_v38  ;;  %v2145_v16 = vld [vmem:[#allocation10 + $0xa4] ss:$16 sps:$4 sm:$0xff] (!%p1773_p5)  }
  0xe4   : > { %909 = vmatpush1.bf16.msra.mxu0 %v2063_v42  ;;  %950 = vmatpush1.bf16.msra.mxu1 %v2066_v43 }
  0xe5   : > { %910 = vmatprep.subr.bf16.mxu0 %v2071_v44  ;;  %951 = vmatprep.subr.bf16.mxu1 %v2074_v45 }
  0xe8   : > { %911 = vmatpush1.bf16.msra.mxu0 %v2069_v46  ;;  %952 = vmatpush1.bf16.msra.mxu1 %v2072_v47 }
  0xe9   : > { %912 = vmatprep.subr.bf16.mxu0 %v2077_v48  ;;  %953 = vmatprep.subr.bf16.mxu1 %v2080_v49  ;;  %v438_v49 = vld [vmem:[#allocation3] sm:$0xff] }
  0xec   : > { %913 = vmatpush1.bf16.msra.mxu0 %v2075_v50  ;;  %954 = vmatpush1.bf16.msra.mxu1 %v2078_v51 }
  0xed   : > { %914 = vmatprep.subr.bf16.mxu0 %v2083_v52  ;;  %955 = vmatprep.subr.bf16.mxu1 %v2086_v53 }
  0xf0   : > { %915 = vmatpush1.bf16.msra.mxu0 %v2081_v54  ;;  %956 = vmatpush1.bf16.msra.mxu1 %v2084_v55 }
  0xf1   : > { %916 = vmatprep.subr.bf16.mxu0 %v2089_v56  ;;  %957 = vmatprep.subr.bf16.mxu1 %v2092_v57 }
  0xf4   : > { %917 = vmatpush1.bf16.msra.mxu0 %v2087_v58  ;;  %958 = vmatpush1.bf16.msra.mxu1 %v2090_v59  ;;  %v2121_v59 = vld [vmem:[#allocation10 + $0x4] ss:$16 sps:$4 sm:$0xff] (!%p1773_p5)  }
  0xf5   : > { %918 = vmatprep.subr.bf16.mxu0 %v2095_v60  ;;  %959 = vmatprep.subr.bf16.mxu1 %v2098_v61  ;;  %v2123_v60 = vld [vmem:[#allocation10] ss:$16 sps:$4 sm:$0xff] (!%p1773_p5)   ;;  %v2473_v61 = vmov (!%p1773_p5), 0  }
  0xf8   : > { %919 = vmatpush1.bf16.msra.mxu0 %v2093_v62  ;;  %960 = vmatpush1.bf16.msra.mxu1 %v2096_v63  ;;  %v2124_v62 = vld [vmem:[#allocation10 + $0x24] ss:$16 sps:$4 sm:$0xff] (!%p1773_p5)   ;;  %v2126_v63 = vld [vmem:[#allocation10 + $0x20] ss:$16 sps:$4 sm:$0xff] (!%p1773_p5)  }
  0xf9   : > { %920 = vmatprep.subr.bf16.mxu0 %v2101_v0  ;;  %961 = vmatprep.subr.bf16.mxu1 %v2104_v1  ;;  %v2127_v0 = vld [vmem:[#allocation10 + $0x44] ss:$16 sps:$4 sm:$0xff] (!%p1773_p5)   ;;  %v2130_v1 = vld [vmem:[#allocation10 + $0xc] ss:$16 sps:$4 sm:$0xff] (!%p1773_p5)  }
  0xfc   : > { %921 = vmatpush1.bf16.msra.mxu0 %v2099_v2  ;;  %962 = vmatpush1.bf16.msra.mxu1 %v2102_v3  ;;  %v2132_v2 = vld [vmem:[#allocation10 + $0x8] ss:$16 sps:$4 sm:$0xff] (!%p1773_p5)   ;;  %v2129_v3 = vld [vmem:[#allocation10 + $0x40] ss:$16 sps:$4 sm:$0xff] (!%p1773_p5)  }
  0xfd   : > { %1253 = vmatprep.subr.bf16.mxu0 (!%p1773_p5), %v2121_v59  ;;  %1293 = vmatprep.subr.bf16.mxu1 (!%p1773_p5), %v2130_v1 }
  0xff   : > { %939 = vmatmul.mubr.bf16.vlgmr.msra.gmra.mrb[4].mxu0 %v2794_v4  ;;  %980 = vmatmul.mubr.bf16.vlgmr.msra.gmra.mrb[4].mxu1 %v2794_v4 }
 0x100   : > { %1285 = vmatprep.mubr.bf16.mxu0 (!%p1773_p5), %v2473_v61  ;;  %1325 = vmatprep.mubr.bf16.mxu1 (!%p1773_p5), %v2473_v61 }
 0x101   : > { %1254 = vmatpush1.bf16.msra.mxu0 (!%p1773_p5), %v2123_v60  ;;  %1294 = vmatpush1.bf16.msra.mxu1 (!%p1773_p5), %v2132_v2 }
 0x102   : > { %1255 = vmatprep.subr.bf16.mxu0 (!%p1773_p5), %v2124_v62 }
 0x105   : > { %1256 = vmatpush1.bf16.msra.mxu0 (!%p1773_p5), %v2126_v63 }
 0x106   : > { %1257 = vmatprep.subr.bf16.mxu0 (!%p1773_p5), %v2127_v0 }
 0x109   : > { %1258 = vmatpush1.bf16.msra.mxu0 (!%p1773_p5), %v2129_v3 }
 0x1b2   : > { %v698_v5 = vpop.f32.mrb[0].mxu0  ;;  %v739_v6 = vpop.f32.mrb[0].mxu1 }
 0x1b3   : > { %v700_v7 = vpop.f32.mrb[1].mxu0  ;;  %v741_v8 = vpop.f32.mrb[1].mxu1 }
 0x1b4   : > { %v702_v9 = vpop.f32.mrb[2].mxu0  ;;  %v743_v10 = vpop.f32.mrb[2].mxu1 }
 0x1b5   : > { %v703_v11 = vpop.f32.mrb[3].mxu0  ;;  %v744_v12 = vpop.f32.mrb[3].mxu1  ;;  %v2142_v9 = vld [vmem:[#allocation10 + $0x4c] ss:$16 sps:$4 sm:$0xff] (!%p1773_p5)   ;;  %v2139_v10 = vld [vmem:[#allocation10 + $0x84] ss:$16 sps:$4 sm:$0xff] (!%p1773_p5)  }
 0x1b6   : > { %v2144_v11 = vld [vmem:[#allocation10 + $0x48] ss:$16 sps:$4 sm:$0xff] (!%p1773_p5)   ;;  %v2148_v12 = vld [vmem:[#allocation10 + $0x6c] ss:$16 sps:$4 sm:$0xff] (!%p1773_p5)  }
 0x1d2   : > { %v940_v19 = vpop.f32.mrb[4].mxu0  ;;  %v981_v20 = vpop.f32.mrb[4].mxu1 }
 0x1d3   : > { %v941_v22 = vadd.f32 %v940_v19, %v698_v5  ;;  %v982_v23 = vadd.f32 %v981_v20, %v739_v6  ;;  %v942_v24 = vpop.f32.mrb[5].mxu0  ;;  %v983_v25 = vpop.f32.mrb[5].mxu1  ;;  %v2136_v5 = vld [vmem:[#allocation10 + $0x2c] ss:$16 sps:$4 sm:$0xff] (!%p1773_p5)   ;;  %v2138_v6 = vld [vmem:[#allocation10 + $0x28] ss:$16 sps:$4 sm:$0xff] (!%p1773_p5)  }
 0x1d4   : > { %v943_v26 = vadd.f32 %v942_v24, %v700_v7  ;;  %v984_v27 = vadd.f32 %v983_v25, %v741_v8  ;;  %v944_v29 = vpop.f32.mrb[6].mxu0  ;;  %v985_v30 = vpop.f32.mrb[6].mxu1  ;;  %v2133_v7 = vld [vmem:[#allocation10 + $0x64] ss:$16 sps:$4 sm:$0xff] (!%p1773_p5)   ;;  %1295 = vmatprep.subr.bf16.mxu1 (!%p1773_p5), %v2136_v5  ;;  %v2135_v8 = vld [vmem:[#allocation10 + $0x60] ss:$16 sps:$4 sm:$0xff] (!%p1773_p5)  }
 0x1d5   : > { %v1010_v31 = vadd.f32 %v993_v18, %v941_v22  ;;  %v945_v32 = vpop.f32.mrb[7].mxu0  ;;  %v986_v33 = vpop.f32.mrb[7].mxu1  ;;  %v1012_v42 = vadd.f32 %v1001_v40, %v982_v23  ;;  %1296 = vmatpush1.bf16.msra.mxu1 (!%p1773_p5), %v2138_v6  ;;  %1259 = vmatprep.subr.bf16.mxu0 (!%p1773_p5), %v2133_v7  ;;  %v2154_v18 = vld [vmem:[#allocation10 + $0x8c] ss:$16 sps:$4 sm:$0xff] (!%p1773_p5)   ;;  %v2147_v19 = vld [vmem:[#allocation10 + $0xa0] ss:$16 sps:$4 sm:$0xff] (!%p1773_p5)  }
 0x1d6   : > { %v1011_v34 = vadd.f32 %v997_v21, %v943_v26  ;;  %v1013_v39 = vadd.f32 %v1005_v37, %v984_v27  ;;  %1297 = vmatprep.subr.bf16.mxu1 (!%p1773_p5), %v2142_v9  ;;  %1260 = vmatpush1.bf16.msra.mxu0 (!%p1773_p5), %v2135_v8  ;;  %v2151_v20 = vld [vmem:[#allocation10 + $0xc4] ss:$16 sps:$4 sm:$0xff] (!%p1773_p5)   ;;  %v2156_v21 = vld [vmem:[#allocation10 + $0x88] ss:$16 sps:$4 sm:$0xff] (!%p1773_p5)   ;;  %v2160_v22 = vld [vmem:[#allocation10 + $0xac] ss:$16 sps:$4 sm:$0xff] (!%p1773_p5)  }
 0x1d7   : > { %v1771_v35 = vmul.f32 -1.442695, %v1010_v31  ;;  %1261 = vmatprep.subr.bf16.mxu0 (!%p1773_p5), %v2139_v10  ;;  %v2153_v23 = vld [vmem:[#allocation10 + $0xc0] ss:$16 sps:$4 sm:$0xff] (!%p1773_p5)   ;;  %v2162_v24 = vld [vmem:[#allocation10 + $0xa8] ss:$16 sps:$4 sm:$0xff] (!%p1773_p5)  }
 0x1d8   : > { %v1770_v36 = vmul.f32 -1.442695, %v1011_v34  ;;  %v1772_v41 = vmul.f32 -1.442695, %v1013_v39  ;;  %v2157_v25 = vld [vmem:[#allocation10 + $0xe4] ss:$16 sps:$4 sm:$0xff] (!%p1773_p5)  }
 0x1d9   : > { %2105 = vpow2.f32 %v1771_v35  ;;  %1298 = vmatpush1.bf16.msra.mxu1 (!%p1773_p5), %v2144_v11  ;;  %v2163_v26 = vld [vmem:[#allocation10 + $0xcc] ss:$16 sps:$4 sm:$0xff] (!%p1773_p5)   ;;  %v2159_v27 = vld [vmem:[#allocation10 + $0xe0] ss:$16 sps:$4 sm:$0xff] (!%p1773_p5)   ;;  %v2165_v29 = vld [vmem:[#allocation10 + $0xc8] ss:$16 sps:$4 sm:$0xff] (!%p1773_p5)  }
 0x1da   : > { %2107 = vpow2.f32 %v1770_v36  ;;  %1299 = vmatprep.subr.bf16.mxu1 (!%p1773_p5), %v2148_v12  ;;  %1262 = vmatpush1.bf16.msra.mxu0 (!%p1773_p5), %v2141_v13  ;;  %v2166_v30 = vld [vmem:[#allocation10 + $0xec] ss:$16 sps:$4 sm:$0xff] (!%p1773_p5)   ;;  %v2168_v31 = vld [vmem:[#allocation10 + $0xe8] ss:$16 sps:$4 sm:$0xff] (!%p1773_p5)   ;;  %v2169_v32 = vld [vmem:[#allocation12] sm:$0xff] (!%p1773_p5)   ;;  %v2474_v33 = vmov (!%p1773_p5), 0.0  }
 0x1db   : > { %2109 = vpow2.f32 %v1772_v41  ;;  %1263 = vmatprep.subr.bf16.mxu0 (!%p1773_p5), %v2145_v16  ;;  %v2170_v34 = vld [vmem:[#allocation13] sm:$0xff] (!%p1773_p5)   ;;  %v2171_v35 = vld [vmem:[#allocation12 + $0x8] sm:$0xff] (!%p1773_p5)   ;;  %v2173_v37 = vld [vmem:[#allocation12 + $0x10] sm:$0xff] (!%p1773_p5)  }
 0x1dc   : > { %2111 = vtanh.f32 %v1012_v42  ;;  %v2172_v36 = vld [vmem:[#allocation13 + $0x8] sm:$0xff] (!%p1773_p5)   ;;  %v2174_v39 = vld [vmem:[#allocation13 + $0x10] sm:$0xff] (!%p1773_p5)   ;;  %v2176_v40 = vld [vmem:[#allocation13 + $0x18] sm:$0xff] (!%p1773_p5)  }
 0x1dd   : > { %1300 = vmatpush1.bf16.msra.mxu1 (!%p1773_p5), %v2150_v17  ;;  %v2177_v41 = vld [vmem:[#allocation12 + $0x20] sm:$0xff] (!%p1773_p5)  }
 0x1de   : > { %1301 = vmatprep.subr.bf16.mxu1 (!%p1773_p5), %v2154_v18  ;;  %1264 = vmatpush1.bf16.msra.mxu0 (!%p1773_p5), %v2147_v19  ;;  %v2178_v42 = vld [vmem:[#allocation13 + $0x20] sm:$0xff] (!%p1773_p5)   ;;  %v1824_v18 = vld [vmem:[%s2908_s22] ss:$0 sm:$0xff] (!%p1773_p5) }
 0x1df   : > { %1265 = vmatprep.subr.bf16.mxu0 (!%p1773_p5), %v2151_v20 }
 0x1e1   : > { %1302 = vmatpush1.bf16.msra.mxu1 (!%p1773_p5), %v2156_v21 }
 0x1e2   : > { %1303 = vmatprep.subr.bf16.mxu1 (!%p1773_p5), %v2160_v22  ;;  %1266 = vmatpush1.bf16.msra.mxu0 (!%p1773_p5), %v2153_v23 }
 0x1e3   : > { %v2106_v43 = vpop.eup %2105  ;;  %1267 = vmatprep.subr.bf16.mxu0 (!%p1773_p5), %v2157_v25 }
 0x1e4   : > { %v2108_v44 = vpop.eup %2107  ;;  %v1024_v45 = vadd.f32 1.0, %v2106_v43  ;;  %v2179_v43 = vld [vmem:[#allocation12 + $0x28] sm:$0xff] (!%p1773_p5)  }
 0x1e5   : > { %v1017_v46 = vadd.f32 1.0, %v2108_v44  ;;  %v2110_v47 = vpop.eup %2109  ;;  %1304 = vmatpush1.bf16.msra.mxu1 (!%p1773_p5), %v2162_v24  ;;  %v2180_v44 = vld [vmem:[#allocation13 + $0x28] sm:$0xff] (!%p1773_p5)  }
 0x1e6   : > { %2113 = vrcp.f32 %v1024_v45  ;;  %v2112_v48 = vpop.eup %2111  ;;  %v1033_v53 = vadd.f32 1.0, %v2110_v47  ;;  %1305 = vmatprep.subr.bf16.mxu1 (!%p1773_p5), %v2163_v26  ;;  %1268 = vmatpush1.bf16.msra.mxu0 (!%p1773_p5), %v2159_v27  ;;  %v2181_v45 = vld [vmem:[#allocation12 + $0x30] sm:$0xff] (!%p1773_p5)   ;;  %v2183_v47 = vld [vmem:[#allocation12 + $0x38] sm:$0xff] (!%p1773_p5)  }
 0x1e7   : > { %2115 = vrcp.f32 %v1017_v46  ;;  %1847 = vmatprep.subr.bf16.mxu0 (!%p1773_p5), %v2474_v33  ;;  %v2182_v46 = vld [vmem:[#allocation13 + $0x30] sm:$0xff] (!%p1773_p5)  }
 0x1e8   : > { %2117 = vrcp.f32 %v1033_v53 }
 0x1e9   : > { %1306 = vmatpush1.bf16.msra.mxu1 (!%p1773_p5), %v2165_v29  ;;  %1286 = vmatmul.mubr.bf16.vlgmr.msra.gmra.mrb[0].mxu0 (!%p1773_p5), %v2794_v4 }
 0x1ea   : > { %1307 = vmatprep.subr.bf16.mxu1 (!%p1773_p5), %v2166_v30  ;;  %1848 = vmatpush3.bf16.msra.mxu0 (!%p1773_p5), %v2170_v34 }
 0x1eb   : > { %1849 = vmatprep.subr.bf16.mxu0 (!%p1773_p5), %v2474_v33  ;;  %1863 = vmatprep.mubr.msk.bf16.mxu0 (!%p1773_p5), %vm2475_vm0, %v2474_v33 }
 0x1ed   : > { %1308 = vmatpush1.bf16.msra.mxu1 (!%p1773_p5), %v2168_v31 }
 0x1ee   : > { %1867 = vmatprep.subr.bf16.mxu1 (!%p1773_p5), %v2474_v33  ;;  %1850 = vmatpush3.bf16.msra.mxu0 (!%p1773_p5), %v2172_v36 }
 0x1ef   : > { %1851 = vmatprep.subr.bf16.mxu0 (!%p1773_p5), %v2474_v33 }
 0x1f0   : > { %v2114_v50 = vpop.eup %2113  ;;  %1326 = vmatmul.mubr.bf16.vlgmr.msra.gmra.mrb[0].mxu1 (!%p1773_p5), %v2794_v4  ;;  %v2175_v4 = vld [vmem:[#allocation12 + $0x18] sm:$0xff] (!%p1773_p5)  }
 0x1f1   : > { %v2116_v51 = vpop.eup %2115  ;;  %v1028_v52 = vmul.f32 %v2114_v50, %v2112_v48  ;;  %1868 = vmatpush3.bf16.msra.mxu1 (!%p1773_p5), %v2169_v32  ;;  %1883 = vmatprep.mubr.msk.bf16.mxu1 (!%p1773_p5), %vm2475_vm0, %v2474_v33  ;;  %v2184_v48 = vld [vmem:[#allocation13 + $0x38] sm:$0xff] (!%p1773_p5)   ;;  %v1076_v50 = vld [vmem:[%s2907_s19] sm:$0xf] (!%p1773_p5) }
 0x1f2   : > { %v1020_v54 = vmul.f32 %v2116_v51, %v438_v49  ;;  %v2118_v56 = vpop.eup %2117  ;;  %1869 = vmatprep.subr.bf16.mxu1 (!%p1773_p5), %v2474_v33  ;;  %1852 = vmatpush3.bf16.msra.mxu0 (!%p1773_p5), %v2174_v39  ;;  %v1081_v51 = vrot.slane (!%p1773_p5), %v1076_v50, %v992_v15  ;;  %v1085_v1 = vrot.slane (!%p1773_p5), %v1076_v50, %v1000_v38 }
 0x1f3   : > { %1853 = vmatprep.subr.bf16.mxu0 (!%p1773_p5), %v2474_v33 }
 0x1f4   : > { %v1029_v55 = vadd.f32 %v1028_v52, %v1020_v54 }
 0x1f5   : > { %1870 = vmatpush3.bf16.msra.mxu1 (!%p1773_p5), %v2171_v35 }
 0x1f6   : > { %2119 = vtanh.f32 %v1029_v55  ;;  %1038 = vst [vmem:[#allocation3] sm:$0xff] %v1029_v55  ;;  %1871 = vmatprep.subr.bf16.mxu1 (!%p1773_p5), %v2474_v33  ;;  %1854 = vmatpush3.bf16.msra.mxu0 (!%p1773_p5), %v2176_v40 }
 0x1f7   : > { %1855 = vmatprep.subr.bf16.mxu0 (!%p1773_p5), %v2474_v33 }
 0x1f9   : > { %1872 = vmatpush3.bf16.msra.mxu1 (!%p1773_p5), %v2173_v37 }
 0x1fa   : > { %1873 = vmatprep.subr.bf16.mxu1 (!%p1773_p5), %v2474_v33  ;;  %1856 = vmatpush3.bf16.msra.mxu0 (!%p1773_p5), %v2178_v42 }
 0x1fb   : > { %1857 = vmatprep.subr.bf16.mxu0 (!%p1773_p5), %v2474_v33 }
 0x1fd   : > { %1043 = sbr.rel (%p1773_p5) target bundleno = 963 (0x3c3), region = 88  ;;  %1874 = vmatpush3.bf16.msra.mxu1 (!%p1773_p5), %v2175_v4 }
 0x1fe   : > { %1875 = vmatprep.subr.bf16.mxu1 (!%p1773_p5), %v2474_v33  ;;  %1858 = vmatpush3.bf16.msra.mxu0 (!%p1773_p5), %v2180_v44 }
 0x1ff   : > { %1859 = vmatprep.subr.bf16.mxu0 (!%p1773_p5), %v2474_v33 }
 0x200   : > { %v2120_v57 = vpop.eup %2119 }
 0x201   : > { %v2813_v58 = vmul.f32 %v2120_v57, %v2118_v56  ;;  %1876 = vmatpush3.bf16.msra.mxu1 (!%p1773_p5), %v2177_v41  ;;  %v1089_v56 = vrot.slane (!%p1773_p5), %v1076_v50, %v1004_v28 }
 0x202   : > { %1877 = vmatprep.subr.bf16.mxu1 (!%p1773_p5), %v2474_v33  ;;  %1860 = vmatpush3.bf16.msra.mxu0 (!%p1773_p5), %v2182_v46 }
 0x203   : > { %1039 = vst [vmem:[#allocation2] sm:$0xff] %v2813_v58  ;;  %v1350_v49 = vpack.c.bf16 (!%p1773_p5), %v2813_v58, %v2813_v58  ;;  %1861 = vmatprep.subr.bf16.mxu0 (!%p1773_p5), %v2474_v33 }
 0x205   : > { %1878 = vmatpush3.bf16.msra.mxu1 %v2179_v43 }
 0x206   : > { %1879 = vmatprep.subr.bf16.mxu1 %v2474_v33  ;;  %1862 = vmatpush3.bf16.msra.mxu0 %v2184_v48 }
 0x209   : > { %1880 = vmatpush3.bf16.msra.mxu1 %v2181_v45 }
 0x20a   : > { %1881 = vmatprep.subr.bf16.mxu1 %v2474_v33 }
 0x20d   : > { %1882 = vmatpush3.bf16.msra.mxu1 %v2183_v47 }
 0x210   : > { %1884 = vmatmul.mubr.bf16.vlgmr.msra.gmra.mrb[4].mxu1 %v1350_v49 }
 0x2bc   : > { %v1287_v52 = vpop.f32.mrb[0].mxu0 }
 0x2bd   : > { %v1288_v53 = vadd.f32 %v1287_v52, %v1081_v51  ;;  %v1289_v54 = vpop.f32.mrb[1].mxu0 }
 0x2be   : > { %v1290_v55 = vpop.f32.mrb[2].mxu0 }
 0x2bf   : > { %v1806_v57 = vmul.f32 -1.442695, %v1288_v53  ;;  %v1291_v58 = vpop.f32.mrb[3].mxu0 }
 0x2c1   : > { %2185 = vpow2.f32 %v1806_v57 }
 0x2c3   : > { %v1327_v59 = vpop.f32.mrb[0].mxu1 }
 0x2c4   : > { %v1329_v60 = vpop.f32.mrb[1].mxu1  ;;  %v1328_v15 = vadd.f32 %v1327_v59, %v1085_v1 }
 0x2c5   : > { %v1330_v61 = vadd.f32 %v1329_v60, %v1089_v56  ;;  %v1331_v62 = vpop.f32.mrb[2].mxu1 }
 0x2c6   : > { %v1332_v63 = vpop.f32.mrb[3].mxu1 }
 0x2c7   : > { %v1807_v0 = vmul.f32 -1.442695, %v1330_v61 }
 0x2c9   : > { %2187 = vpow2.f32 %v1807_v0 }
 0x2ca   : > { %2189 = vtanh.f32 %v1328_v15 }
 0x2cb   : > { %v2186_v2 = vpop.eup %2185 }
 0x2cc   : > { %v1337_v3 = vadd.f32 1.0, %v2186_v2 }
 0x2ce   : > { %2191 = vrcp.f32 %v1337_v3 }
 0x2d3   : > { %v2188_v5 = vpop.eup %2187 }
 0x2d4   : > { %v1345_v28 = vadd.f32 1.0, %v2188_v5  ;;  %v2190_v6 = vpop.eup %2189 }
 0x2d6   : > { %2193 = vrcp.f32 %v1345_v28 }
 0x2d8   : > { %v2192_v7 = vpop.eup %2191 }
 0x2d9   : > { %v1341_v8 = vmul.f32 %v2192_v7, %v2190_v6 }
 0x2db   : > { %2195 = vtanh.f32 %v1341_v8 }
 0x2e0   : > { %v2194_v9 = vpop.eup %2193 }
 0x2e3   : > { %v1554_v14 = vpop.f32.mrb[4].mxu1 }
 0x2e4   : > { %v1885_v38 = vpop.f32.mrb[5].mxu1 }
 0x2e5   : > { %v2196_v10 = vpop.eup %2195  ;;  %v1557_v13 = vpop.f32.mrb[6].mxu1 }
 0x2e6   : > { %v1349_v11 = vmul.f32 %v2196_v10, %v2194_v9  ;;  %v1886_v16 = vpop.f32.mrb[7].mxu1 }
 0x2e8   : > { %v1367_v12 = vpack.c.bf16 %v1349_v11, %v1349_v11 }
 0x2ea   : > { %1864 = vmatmul.mubr.bf16.vlgmr.msra.gmra.mrb[4].mxu0 %v1367_v12 }
 0x3bd   : > { %v1466_v17 = vpop.f32.mrb[4].mxu0 }
 0x3be   : > { %v1555_v19 = vadd.f32 %v1554_v14, %v1466_v17  ;;  %v1865_v20 = vpop.f32.mrb[5].mxu0 }
 0x3bf   : > { %v1469_v21 = vpop.f32.mrb[6].mxu0 }
 0x3c0   : > { %v1567_v22 = vadd.f32 %v1824_v18, %v1555_v19  ;;  %v1866_v23 = vpop.f32.mrb[7].mxu0 }
 0x3c2   : > { %1568 = vst [vmem:[#allocation15] sm:$0xff] %v1567_v22 }
 0x3c3 PF: > { %s2909_s15 = sadd.s32 4294967295, %s2459_s14   ;;  %s2476_s27 = smov [#allocation15]  }
 0x3c4   : > { %p2835_p11 = scmp.eq.s32.totalorder %s2909_s15, 7  ;;  %s1578_s23 = sshll.u32 %s2476_s27, 4  ;;  %s1579_s23 = int_to_ptr.vmem [resolvable:$true] %s1578_s23 }
 0x3c5   : > { %s2367_s25 = scalar_lea.vmem %s1579_s23, 128  ;;  %p2374_p2 = scmp.lt.s32.totalorder %s1579_s23, %s1579_s23 }
 0x3c6   : > { %p2368_p12 = scmp.ne.s32.totalorder %s1579_s23, %s2367_s25  ;;  %p2375_p6 = scmp.lt.s32.totalorder %s2367_s25, %s2367_s25 }
 0x3c8   : > { %p2369_p13 = pnand %p2368_p12, %p2835_p11  ;;  %p2376_p9 = por %p2375_p6, %p2374_p2 }
 0x3ca   : > { %p2370_p0 = pneg %p2369_p13 }
 0x3cc   : > { %p2377_p7 = pnand %p2376_p9, %p2370_p0 }
 0x3ce   : > { %2380 = shalt.err (!%p2377_p7)
}
 0x3cf   : > { %s2911_s20 = sld [smem:[#allocation23_spill]] }
 0x3d5   : > { %s2381_s28 = scalar_lea.hbm %s2911_s20, 128 }
 0x3d6   : > { %p2382_p1 = scmp.ne.s32.totalorder %s2911_s20, %s2381_s28  ;;  %p2387_p8 = scmp.lt.u32.totalorder %s2381_s28, %s2911_s20 }
 0x3d8   : > { %p2383_p3 = pnand %p2382_p1, %p2835_p11 }
 0x3da   : > { %p2384_p10 = pneg %p2383_p3 }
 0x3dc   : > { %p2389_p4 = pnand %p2387_p8, %p2384_p10 }
 0x3de   : > { %2392 = shalt.err (!%p2389_p4)
}
 0x3df   : > { %1910 = dma.vmem_to_hbm [thread:$0]  (%p2835_p11), %s1579_s23, 128, %s2911_s20, [#allocation6]  }
 0x3e0   : > { %2434 = dma.done.wait (%p2835_p11), [#allocation6], 128  }
 0x3e1   : > { %2436 = vsyncadd (%p2835_p11), [#allocation6], 4294967168 }
 0x3e2 PF: > { %s26_s14 = sadd.s32 1, %s2459_s14   ;;  %s2912_s30 = smov %s2443_s10 }
 0x3e3   : > { %p23_p5 = scmp.ge.s32.totalorder %s26_s14, 10   ;;  %s2913_s10 = smov %s2447_s11 }
 0x3e4   : > { %s2914_s11 = smov %s2725_s29  ;;  %s2915_s12 = smov %s2455_s13 }
 0x3e5   : > { %s2916_s13 = smov %s2918_s18  ;;  %25 = sbr.rel (!%p23_p5) target bundleno = 12 (0xc), region = 122 }
 0x3ec   :  { %1591 = vsyncpa [#allocation5], 1 }
 0x3ed   :  { %1593 = vsyncpa [#allocation5 + $0x1], 1 }
 0x3ee   :  { %1594 = vsyncpa [#allocation8], 1 }
 0x3ef   :  { %1595 = vsyncpa [#allocation11], 1 }
 0x3f0   :  { %1596 = vsyncpa [#allocation14], 1 }
 0x3f1   :  { %1597 = vsyncpa [#allocation6], 1 }
 0x3f2   :  { %1599 = vsyncpa [#allocation6 + $0x1], 1 }

</bundles_post_ra>
